<compile_context>
chip_gen: v5e
topology: v5e:2x2
jax: 0.10.0
libtpu: 0.0.40
codegen_flags: <defaults>
</compile_context>

<pallas_src>
import jax
import jax.numpy as jnp
from jax.experimental import pallas as pl
from jax.experimental.pallas import tpu as pltpu


def _round_up(x, m):
    return ((x + m - 1) // m) * m


def _pwff_kernel(x_ref, w1_ref, b1_ref, w2_ref, b2_ref, o_ref):
    # x_ref/o_ref: (TM, H) activation dtype. w*_ref: (H, H), (in, out) layout.
    # b*_ref: (1, H) f32.
    x = x_ref[...]
    # First 1x1 conv: MXU matmul, operands in the weights' dtype, f32 accum.
    h = jnp.dot(x.astype(w1_ref.dtype), w1_ref[...],
                preferred_element_type=jnp.float32)
    h = jnp.maximum(h + b1_ref[...], 0.0)                 # bias + ReLU in f32
    # TODO(synk): dropout1/dropout2 are identity at inference; training-mode
    # dropout (pltpu.prng_random_bits masking) is not implemented here.
    # Second 1x1 conv.
    y = jnp.dot(h.astype(w2_ref.dtype), w2_ref[...],
                preferred_element_type=jnp.float32)
    y = y + b2_ref[...] + x.astype(jnp.float32)           # bias + residual in f32
    o_ref[...] = y.astype(o_ref.dtype)


def prepare_pwff_params(w1, b1, w2, b2, *, matmul_dtype=None):
    """Once-per-layer prep (hoisted out of the per-call path).

    w1/w2: Conv1d(kernel_size=1) weights with shape (out, in) (kernel dim
    squeezed). Returns (W1^T, b1, W2^T, b2) with weights in (in, out) layout
    (optionally cast to matmul_dtype, e.g. bf16 on v5e) and biases as (1,H) f32.
    """
    wd = matmul_dtype if matmul_dtype is not None else w1.dtype
    w1_t = jnp.asarray(w1.T, dtype=wd)
    w2_t = jnp.asarray(w2.T, dtype=wd)
    b1_r = b1.astype(jnp.float32).reshape(1, -1)
    b2_r = b2.astype(jnp.float32).reshape(1, -1)
    return w1_t, b1_r, w2_t, b2_r


def pointwise_feedforward(x, params, *, tm=None):
    """x: (B, L, H). params: output of prepare_pwff_params. Returns (B, L, H)."""
    w1_t, b1_r, w2_t, b2_r = params
    B, L, H = x.shape
    M = B * L
    dt = x.dtype
    act_isz = jnp.dtype(dt).itemsize
    w_isz = jnp.dtype(w1_t.dtype).itemsize

    # ---- Generation-aware VMEM budget -------------------------------------
    try:
        vmem_cap = int(pltpu.get_tpu_info().vmem_capacity_bytes)
    except Exception:
        vmem_cap = 64 * 1024 * 1024            # conservative (v7x per-core)
    budget = (vmem_cap * 3) // 4               # ~48 MiB v7x, ~96 MiB v5e/v6e

    resident = 2 * H * H * w_isz + 2 * H * 4           # single-buffered W + biases
    per_row = 2 * 2 * H * act_isz + 2 * H * 4          # dbl-buffered x/out + f32 temps
    # TODO(synk): if the single-buffered weights alone exceed the VMEM budget
    # (H >~ 2048 f32 on v7x), tile the hidden dims (N, plus K with a pl.when
    # accumulator) instead of relying on fully resident weights.

    # ---- Row-tile size -----------------------------------------------------
    if tm is None:
        tm = _round_up(max((4 << 20) // max(H * act_isz, 1), 8), 8)  # ~4 MiB block
        tm = min(max(tm, 256), 4096)
    tm = min(tm, _round_up(M, 8))
    fit = (max(budget - resident, per_row * 8) // per_row) // 8 * 8
    tm = max(min(tm, fit), 8)
    if M >= 2048 and pl.cdiv(M, tm) < 2:       # keep both v7x TensorCores busy
        tm = _round_up(pl.cdiv(M, 2), 8)
    grid = (pl.cdiv(M, tm),)                   # ragged last tile handled by pipeline

    est = resident + tm * per_row
    vmem_limit = int(min(max(est * 5 // 4, 16 << 20), budget))

    cost = pl.CostEstimate(
        flops=4 * M * H * H,
        transcendentals=0,
        bytes_accessed=2 * M * H * act_isz + 2 * H * H * w_isz + 2 * H * 4,
    )

    x2d = x.reshape(M, H)                      # free reshape, no copy/pad
    resident_mode = pl.Buffered(1)             # constant index_map -> single buffer

    out2d = pl.pallas_call(
        _pwff_kernel,
        out_shape=jax.ShapeDtypeStruct((M, H), dt),
        grid_spec=pl.GridSpec(
            grid=grid,
            in_specs=[
                pl.BlockSpec((tm, H), lambda i: (i, 0)),               # x: tiled over M
                pl.BlockSpec((H, H), lambda i: (0, 0), pipeline_mode=resident_mode),
                pl.BlockSpec((1, H), lambda i: (0, 0), pipeline_mode=resident_mode),
                pl.BlockSpec((H, H), lambda i: (0, 0), pipeline_mode=resident_mode),
                pl.BlockSpec((1, H), lambda i: (0, 0), pipeline_mode=resident_mode),
            ],
            out_specs=pl.BlockSpec((tm, H), lambda i: (i, 0)),
        ),
        compiler_params=pltpu.CompilerParams(
            dimension_semantics=("parallel",),  # shard M across TCs (v7x)
            vmem_limit_bytes=vmem_limit,
        ),
        cost_estimate=cost,
    )(x2d, w1_t, b1_r, w2_t, b2_r)

    return out2d.reshape(B, L, H)


def _reference(x, w1, b1, w2, b2):
    # Pure JAX reference of the PyTorch forward (eval mode).
    h = jnp.einsum("blh,oh->blo", x, w1) + b1
    h = jnp.maximum(h, 0.0)
    y = jnp.einsum("blh,oh->blo", h, w2) + b2
    return y + x


if __name__ == "__main__":
    key = jax.random.PRNGKey(0)
    kx, k1, k2, k3, k4, kx2 = jax.random.split(key, 6)

    # SASRec-style small shapes: batch=2, seq_len=8, hidden_units=32.
    B, L, H = 2, 8, 32
    x = jax.random.normal(kx, (B, L, H), dtype=jnp.float32)
    # Conv1d(hidden, hidden, kernel_size=1) weights: (out, in) after squeezing
    # the kernel dim; biases: (out,).
    w1 = jax.random.normal(k1, (H, H), dtype=jnp.float32) * 0.1
    b1 = jax.random.normal(k2, (H,), dtype=jnp.float32) * 0.1
    w2 = jax.random.normal(k3, (H, H), dtype=jnp.float32) * 0.1
    b2 = jax.random.normal(k4, (H,), dtype=jnp.float32) * 0.1

    params = prepare_pwff_params(w1, b1, w2, b2)   # hoisted, once per layer

    out = jax.block_until_ready(pointwise_feedforward(x, params))
    ref = _reference(x, w1, b1, w2, b2)
    assert out.shape == (B, L, H)
    assert jnp.allclose(out, ref, atol=1e-4, rtol=1e-4), "mismatch vs reference"

    # Multi-tile + ragged last-tile path: M=20 rows with a forced 16-row tile
    # (grid of 2, last tile partially out of bounds).
    B2, L2 = 2, 10
    x2 = jax.random.normal(kx2, (B2, L2, H), dtype=jnp.float32)
    out2 = jax.block_until_ready(pointwise_feedforward(x2, params, tm=16))
    ref2 = _reference(x2, w1, b1, w2, b2)
    assert out2.shape == (B2, L2, H)
    assert jnp.allclose(out2, ref2, atol=1e-4, rtol=1e-4), "mismatch (ragged tile)"

    print("KERNEL_OK")
</pallas_src>

<mosaic_0001>
module attributes {stable_mosaic.version = 11 : i64} {
  func.func @_pwff_kernel(%arg0: i32, %arg1: memref<16x32xf32, #tpu.memory_space<vmem>>, %arg2: memref<32x32xf32, #tpu.memory_space<vmem>>, %arg3: memref<1x32xf32, #tpu.memory_space<vmem>>, %arg4: memref<32x32xf32, #tpu.memory_space<vmem>>, %arg5: memref<1x32xf32, #tpu.memory_space<vmem>>, %arg6: memref<16x32xf32, #tpu.memory_space<vmem>>) attributes {dimension_semantics = [#tpu.dimension_semantics<parallel>], iteration_bounds = array<i64: 1>, scalar_prefetch = 0 : i64, scratch_operands = 0 : i64, tpu.core_type = #tpu.core_type<tc>, window_params = [{transform_indices = @transform_0, window_bounds = array<i64: 16, 32>}, {pipeline_mode = #tpu.pipeline_mode<synchronous>, transform_indices = @transform_1, window_bounds = array<i64: 32, 32>}, {pipeline_mode = #tpu.pipeline_mode<synchronous>, transform_indices = @transform_2, window_bounds = array<i64: 1, 32>}, {pipeline_mode = #tpu.pipeline_mode<synchronous>, transform_indices = @transform_3, window_bounds = array<i64: 32, 32>}, {pipeline_mode = #tpu.pipeline_mode<synchronous>, transform_indices = @transform_4, window_bounds = array<i64: 1, 32>}, {transform_indices = @transform_5, window_bounds = array<i64: 16, 32>}]} {
    %c0 = arith.constant 0 : index
    %c0_0 = arith.constant 0 : index
    %0 = vector.load %arg1[%c0, %c0_0] : memref<16x32xf32, #tpu.memory_space<vmem>>, vector<16x32xf32>
    %c0_1 = arith.constant 0 : index
    %c0_2 = arith.constant 0 : index
    %1 = vector.load %arg2[%c0_1, %c0_2] : memref<32x32xf32, #tpu.memory_space<vmem>>, vector<32x32xf32>
    %cst = arith.constant dense<0.000000e+00> : vector<16x32xf32>
    %2 = tpu.matmul %0, %1, %cst {dimension_numbers = #tpu.dot_dimension_numbers<[1], [0], [0], [1], [0, 0, 1, 1], [], []>} : vector<16x32xf32>, vector<32x32xf32>, vector<16x32xf32> -> vector<16x32xf32>
    %c0_3 = arith.constant 0 : index
    %c0_4 = arith.constant 0 : index
    %3 = vector.load %arg3[%c0_3, %c0_4] : memref<1x32xf32, #tpu.memory_space<vmem>>, vector<1x32xf32>
    %4 = vector.broadcast %3 : vector<1x32xf32> to vector<16x32xf32>
    %5 = arith.addf %2, %4 : vector<16x32xf32>
    %cst_5 = arith.constant 0.000000e+00 : f32
    %6 = vector.broadcast %cst_5 : f32 to vector<16x32xf32>
    %7 = arith.maximumf %5, %6 : vector<16x32xf32>
    %c0_6 = arith.constant 0 : index
    %c0_7 = arith.constant 0 : index
    %8 = vector.load %arg4[%c0_6, %c0_7] : memref<32x32xf32, #tpu.memory_space<vmem>>, vector<32x32xf32>
    %cst_8 = arith.constant dense<0.000000e+00> : vector<16x32xf32>
    %9 = tpu.matmul %7, %8, %cst_8 {dimension_numbers = #tpu.dot_dimension_numbers<[1], [0], [0], [1], [0, 0, 1, 1], [], []>} : vector<16x32xf32>, vector<32x32xf32>, vector<16x32xf32> -> vector<16x32xf32>
    %c0_9 = arith.constant 0 : index
    %c0_10 = arith.constant 0 : index
    %10 = vector.load %arg5[%c0_9, %c0_10] : memref<1x32xf32, #tpu.memory_space<vmem>>, vector<1x32xf32>
    %11 = vector.broadcast %10 : vector<1x32xf32> to vector<16x32xf32>
    %12 = arith.addf %9, %11 : vector<16x32xf32>
    %13 = arith.addf %12, %0 : vector<16x32xf32>
    %c0_11 = arith.constant 0 : index
    %c0_12 = arith.constant 0 : index
    %14 = vector.load %arg6[%c0_11, %c0_12] : memref<16x32xf32, #tpu.memory_space<vmem>>, vector<16x32xf32>
    tpu.vector_store %arg6[%c0_11, %c0_12], %13 {strides = array<i32>} : memref<16x32xf32, #tpu.memory_space<vmem>>, vector<16x32xf32>,
    return
  }
  func.func @transform_0(%arg0: i32) -> (i32, i32) {
    %c0_i32 = arith.constant 0 : i32
    %c0_i32_0 = arith.constant 0 : i32
    return %arg0, %c0_i32 : i32, i32
  }
  func.func @transform_1(%arg0: i32) -> (i32, i32) {
    %c0_i32 = arith.constant 0 : i32
    %c0_i32_0 = arith.constant 0 : i32
    %c0_i32_1 = arith.constant 0 : i32
    return %c0_i32, %c0_i32_0 : i32, i32
  }
  func.func @transform_2(%arg0: i32) -> (i32, i32) {
    %c0_i32 = arith.constant 0 : i32
    %c0_i32_0 = arith.constant 0 : i32
    %c0_i32_1 = arith.constant 0 : i32
    return %c0_i32, %c0_i32_0 : i32, i32
  }
  func.func @transform_3(%arg0: i32) -> (i32, i32) {
    %c0_i32 = arith.constant 0 : i32
    %c0_i32_0 = arith.constant 0 : i32
    %c0_i32_1 = arith.constant 0 : i32
    return %c0_i32, %c0_i32_0 : i32, i32
  }
  func.func @transform_4(%arg0: i32) -> (i32, i32) {
    %c0_i32 = arith.constant 0 : i32
    %c0_i32_0 = arith.constant 0 : i32
    %c0_i32_1 = arith.constant 0 : i32
    return %c0_i32, %c0_i32_0 : i32, i32
  }
  func.func @transform_5(%arg0: i32) -> (i32, i32) {
    %c0_i32 = arith.constant 0 : i32
    %c0_i32_0 = arith.constant 0 : i32
    return %arg0, %c0_i32 : i32, i32
  }
}

</mosaic_0001>

<bundles_post_ra>
// kernel: tpu_custom_call.1
= control target key start
LH: loop header
LB: loop body
LE: loop exit
PB: predicated region body
PF: predicated region fallthrough
CT: control target
= control target key end

     0   :  { %10 = vsyncpa [#allocation3], 0  ;;  %s365_s0 = inlined_call_operand.hbm [shape: f32[16,32], index: 0, kind: input, shape index: {}]   ;;  %s366_s1 = inlined_call_operand.hbm [shape: f32[32,32], index: 1, kind: input, shape index: {}]   ;;  %s367_s2 = inlined_call_operand.vmem [shape: f32[1,32], index: 2, kind: input, shape index: {}]   ;;  %s368_s3 = inlined_call_operand.hbm [shape: f32[32,32], index: 3, kind: input, shape index: {}]   ;;  %s369_s4 = inlined_call_operand.vmem [shape: f32[1,32], index: 4, kind: input, shape index: {}]   ;;  %s370_s5 = inlined_call_operand.hbm [shape: f32[16,32], index: 5, kind: output, shape index: {}]  }
   0x1   :  { %11 = vsyncpa [#allocation6], 0 }
   0x2   :  { %12 = vsyncpa [#allocation4], 0  ;;  %s30_s20 = sshll.u32 %s366_s1, 4  ;;  %s293_s21 = smov [#allocation5]   ;;  %s31_s20 = int_to_ptr.hbm [resolvable:$true] %s30_s20 }
   0x3   :  { %s32_s22 = sshll.u32 %s293_s21, 4  ;;  %s17_s25 = sshll.u32 %s365_s0, 4  ;;  %s33_s22 = int_to_ptr.vmem [resolvable:$true] %s32_s22  ;;  %s18_s25 = int_to_ptr.hbm [resolvable:$true] %s17_s25 }
   0x4   :  { %s294_s26 = smov 128   ;;  %s295_s27 = smov 8  }
   0x5   :  { %38 = dma.hbm_to_vmem [thread:$0]  %s31_s20, 512, %s33_s22, [#allocation6], %s294_s26, %s294_s26, %s295_s27  }
   0x6   :  { %s296_s28 = smov [#allocation2]   ;;  %s45_s1 = sshll.u32 %s368_s3, 4  ;;  %s46_s1 = int_to_ptr.hbm [resolvable:$true] %s45_s1 }
   0x7   :  { %s19_s29 = sshll.u32 %s296_s28, 4  ;;  %s297_s0 = smov [#allocation7]   ;;  %s20_s29 = int_to_ptr.vmem [resolvable:$true] %s19_s29 }
   0x8   :  { %25 = dma.hbm_to_vmem [thread:$0]  %s18_s25, 256, %s20_s29, [#allocation3], %s294_s26, %s294_s26, %s295_s27  }
   0x9   :  { %s47_s7 = sshll.u32 %s297_s0, 4  ;;  %s48_s7 = int_to_ptr.vmem [resolvable:$true] %s47_s7 }
   0xa   :  { %53 = dma.hbm_to_vmem [thread:$0]  %s46_s1, 512, %s48_s7, [#allocation6], %s294_s26, %s294_s26, %s295_s27  }
   0xb   :  { %287 = dma.done.wait [#allocation3], 256  }
   0xc   :  { %288 = vsyncadd [#allocation3], 4294967040 }
   0xd   :  { %289 = dma.done.wait [#allocation6], 1024  }
   0xe   :  { %290 = vsyncadd [#allocation6], 4294966272  ;;  %v73_v0 = vld [vmem:[#allocation5 + $0x18] sm:$0xff]  ;;  %v72_v1 = vld [vmem:[#allocation5 + $0x10] sm:$0xff]  ;;  %vm78_vm0 = vcmask 261120   ;;  %s157_s14 = sshll.u32 %s370_s5, 4  ;;  %s158_s14 = int_to_ptr.hbm [resolvable:$true] %s157_s14 }
   0xf   :  { %175 = vmatpush.msra.mxu2 %v73_v0  ;;  %97 = vmatpush.msra.mxu0 %v73_v0  ;;  %v71_v2 = vld [vmem:[#allocation5 + $0x8] sm:$0xff]  ;;  %v113_v3 = vld [vmem:[#allocation7 + $0x18] sm:$0xff]  ;;  %v70_v4 = vld [vmem:[#allocation5] sm:$0xff] }
  0x10   :  { %179 = vmatpush.msra.mxu3 %v113_v3  ;;  %136 = vmatpush.msra.mxu1 %v113_v3  ;;  %v69_v5 = vld [vmem:[#allocation2 + $0x8] sm:$0xff]  ;;  %v68_v6 = vld [vmem:[#allocation2] sm:$0xff]  ;;  %v111_v8 = vld [vmem:[#allocation7 + $0x8] sm:$0xff] }
  0x11   :  { %176 = vmatpush.msra.mxu2 %v72_v1  ;;  %98 = vmatpush.msra.mxu0 %v72_v1  ;;  %v112_v7 = vld [vmem:[#allocation7 + $0x10] sm:$0xff]  ;;  %v110_v9 = vld [vmem:[#allocation7] sm:$0xff] }
  0x12   :  { %180 = vmatpush.msra.mxu3 %v112_v7  ;;  %137 = vmatpush.msra.mxu1 %v112_v7  ;;  %v189_v10 = vld [vmem:[%s367_s2] ss:$0 sm:$0xff]  ;;  %s298_s2 = smov [#allocation8]  }
  0x13   :  { %177 = vmatpush.msra.mxu2 %v71_v2  ;;  %99 = vmatpush.msra.mxu0 %v71_v2  ;;  %v190_v17 = vld [vmem:[%s369_s4] ss:$0 sm:$0xff]  ;;  %s155_s11 = sshll.u32 %s298_s2, 4  ;;  %s156_s11 = int_to_ptr.vmem [resolvable:$true] %s155_s11 }
  0x14   :  { %181 = vmatpush.msra.mxu3 %v111_v8  ;;  %138 = vmatpush.msra.mxu1 %v111_v8 }
  0x15   :  { %178 = vmatpush.msra.mxu2 %v70_v4  ;;  %100 = vmatpush.msra.mxu0 %v70_v4 }
  0x16   :  { %172 = vmatmul.msk.f32.vlgmr.msra.gmra.mxu2 %vm78_vm0, %v69_v5  ;;  %171 = vmatmul.msk.f32.vlgmr.msra.gmra.mxu0 %vm78_vm0, %v68_v6 }
  0x17   :  { %182 = vmatpush.msra.mxu3 %v110_v9  ;;  %139 = vmatpush.msra.mxu1 %v110_v9 }
  0x93   :  { %v102_v11 = vpop.f32.mrf.mxu0 }
  0x94   :  { %v103_v12 = vadd.f32 %v189_v10, %v102_v11 }
  0x96   :  { %v108_v13 = vmax.f32 %v103_v12, 0.0 }
  0x98   :  { %173 = vmatmul.msk.f32.vlgmr.msra.gmra.mxu1 %vm78_vm0, %v108_v13 }
  0x99   :  { %v105_v14 = vpop.f32.mrf.mxu2 }
  0x9a   :  { %v106_v15 = vadd.f32 %v189_v10, %v105_v14 }
  0x9c   :  { %v109_v16 = vmax.f32 %v106_v15, 0.0 }
  0x9e   :  { %174 = vmatmul.msk.f32.vlgmr.msra.gmra.mxu3 %vm78_vm0, %v109_v16 }
 0x115   :  { %v141_v18 = vpop.f32.mrf.mxu1 }
 0x116   :  { %v142_v19 = vadd.f32 %v190_v17, %v141_v18 }
 0x118   :  { %v147_v20 = vadd.f32 %v142_v19, %v68_v6 }
 0x11a   :  { %149 = vst.msk [vmem:[#allocation8] sm:$0xff] %vm78_vm0, %v147_v20 }
 0x121   :  { %v144_v21 = vpop.f32.mrf.mxu3 }
 0x122   :  { %v145_v22 = vadd.f32 %v190_v17, %v144_v21 }
 0x124   :  { %v148_v23 = vadd.f32 %v145_v22, %v69_v5 }
 0x126   :  { %150 = vst.msk [vmem:[#allocation8 + $0x8] sm:$0xff] %vm78_vm0, %v148_v23 }
 0x127   :  { %163 = dma.vmem_to_hbm [thread:$0]  %s156_s11, 256, %s158_s14, [#allocation4], %s294_s26, %s294_s26, %s295_s27  }
 0x128   :  { %291 = dma.done.wait [#allocation4], 256  }
 0x129   :  { %292 = vsyncadd [#allocation4], 4294967040 }
 0x12a   :  { %168 = vsyncpa [#allocation3], 1 }
 0x12b   :  { %169 = vsyncpa [#allocation6], 1 }
 0x12c   :  { %170 = vsyncpa [#allocation4], 1 }

</bundles_post_ra>
